<compile_context>
chip_gen: v5e
topology: v5e:2x2
jax: 0.10.0
libtpu: 0.0.40
codegen_flags: <defaults>
</compile_context>

<pallas_src>
import math

import jax
import jax.numpy as jnp
from jax.experimental import pallas as pl
from jax.experimental.pallas import tpu as pltpu


def make_positional_encoding(embedding_dim: int, max_len: int = 1000) -> jnp.ndarray:
    """Deterministic sinusoidal table, same formula as the PyTorch __init__."""
    position = jnp.arange(0, max_len, dtype=jnp.float32)[:, None]            # (max_len, 1)
    div_term = jnp.exp(
        jnp.arange(0, embedding_dim, 2, dtype=jnp.float32)
        * (-math.log(10000.0) / embedding_dim)
    )                                                                         # (ceil(D/2),)
    angles = position * div_term                                              # (max_len, ceil(D/2))
    enc = jnp.zeros((max_len, embedding_dim), dtype=jnp.float32)
    enc = enc.at[:, 0::2].set(jnp.sin(angles))
    enc = enc.at[:, 1::2].set(jnp.cos(angles)[:, : embedding_dim // 2])
    return enc                                                                # (max_len, D)


def _pe_add_kernel(x_ref, pe_ref, o_ref):
    # x_ref: (b_tile, f_tile); pe_ref: (1, f_tile), broadcast over the batch rows.
    o_ref[...] = x_ref[...] + pe_ref[...]


def _vmem_budget():
    """Generation-aware (vmem_limit_bytes, target bytes per x block)."""
    try:
        vmem_cap = int(pltpu.get_tpu_info().vmem_capacity_bytes)
    except Exception:
        vmem_cap = 64 * 1024 * 1024       # conservative fallback (v7x-sized)
    # Leave ~25% headroom below physical VMEM, never above 96 MiB.
    #   v7x (64 MiB)      -> limit 48 MiB
    #   v5e/v6e (128 MiB) -> limit 96 MiB
    vmem_limit = min((vmem_cap * 3) // 4, 96 * 1024 * 1024)
    # Resident estimate: 2 buffers x (x block + out block + sublane-padded PE
    # block) ~= 6-8x one x block when b_tile >= 8, so target vmem_limit / 8.
    #   v7x -> ~6 MiB blocks, v5e/v6e -> ~12 MiB blocks.
    target_block_bytes = vmem_limit // 8
    return vmem_limit, target_block_bytes


def _choose_tiles(B: int, F: int, itemsize: int, target_block_bytes: int):
    """Tile sizes respecting the (8, 128) layout rules and the VMEM budget."""
    b_tile = B if B <= 8 else 8
    # The (1, f_tile) PE block pads to 8 sublanes in VMEM, so budget the
    # footprint with at least 8 rows even when b_tile < 8.
    rows = max(b_tile, 8)
    max_f = max(target_block_bytes // (rows * itemsize), 128)
    if F <= max_f:
        f_tile = F                                  # full flat dim (layout-legal)
    else:
        f_tile = (max_f // 128) * 128               # multiple of 128
    # If the flat dim fit entirely, grow b_tile (multiples of 8) toward the
    # block-size target: fewer grid steps, larger DMA descriptors.
    if B > 8:
        while (b_tile + 8 <= B
               and (b_tile + 8) * f_tile * itemsize <= target_block_bytes):
            b_tile += 8
    return b_tile, f_tile


def positional_encoding_forward(
    x: jnp.ndarray,
    encoding: jnp.ndarray,
    *,
    force_pallas: bool = False,
    small_input_bytes: int = 1 << 20,
) -> jnp.ndarray:
    """x: (B, T, D). encoding: (max_len, D). Returns x + encoding[None, :T, :]."""
    B, T, D = x.shape
    max_len = encoding.shape[0]
    assert T <= max_len, f"sequence length {T} exceeds max_len {max_len}"

    pe_slice = encoding[:T, :].astype(x.dtype)                 # (T, D)
    itemsize = jnp.dtype(x.dtype).itemsize

    # Fast path: tiny inputs are 100% launch/grid overhead in a kernel; the
    # fused XLA broadcast add is strictly faster.  (__main__ forces Pallas.)
    if not force_pallas and (B * T * D * itemsize) < small_input_bytes:
        return x + pe_slice[None, :, :]

    # Lane-dense flattening: (B, T, D) -> (B, T*D); pe -> (1, T*D).
    F = T * D
    x2 = x.reshape(B, F)
    pe2 = pe_slice.reshape(1, F)

    vmem_limit, target_block_bytes = _vmem_budget()
    b_tile, f_tile = _choose_tiles(B, F, itemsize, target_block_bytes)
    # F outer, B inner: PE block index (0, f) is constant across the inner
    # batch iterations -> DMA'd once per F tile, reused across batch tiles.
    grid = (pl.cdiv(F, f_tile), pl.cdiv(B, b_tile))

    out2 = pl.pallas_call(
        _pe_add_kernel,
        out_shape=jax.ShapeDtypeStruct((B, F), x.dtype),
        grid_spec=pl.GridSpec(
            grid=grid,
            in_specs=[
                pl.BlockSpec((b_tile, f_tile), lambda f, b: (b, f)),
                pl.BlockSpec((1, f_tile), lambda f, b: (0, f)),
            ],
            out_specs=pl.BlockSpec((b_tile, f_tile), lambda f, b: (b, f)),
        ),
        compiler_params=pltpu.CompilerParams(
            # Outer F axis parallel (megacore sharding); inner batch axis
            # arbitrary so sequential iteration locks in PE-block reuse.
            dimension_semantics=("parallel", "arbitrary"),
            vmem_limit_bytes=vmem_limit,
        ),
    )(x2, pe2)

    return out2.reshape(B, T, D)


def positional_encoding_ref(x: jnp.ndarray, encoding: jnp.ndarray) -> jnp.ndarray:
    T = x.shape[1]
    return x + encoding[None, :T, :].astype(x.dtype)


if __name__ == "__main__":
    embedding_dim = 32
    max_len = 1000
    B, T = 2, 8

    encoding = make_positional_encoding(embedding_dim, max_len)

    key = jax.random.PRNGKey(0)
    x = jax.random.normal(key, (B, T, embedding_dim), dtype=jnp.float32)

    ref = positional_encoding_ref(x, encoding)

    # Exercise the Pallas kernel itself (force past the small-input fast path).
    out = positional_encoding_forward(x, encoding, force_pallas=True)
    out = jax.block_until_ready(out)
    assert out.shape == (B, T, embedding_dim)
    assert jnp.allclose(out, ref, atol=1e-6, rtol=1e-6), "pallas path mismatch vs reference"

    # Also sanity-check the small-input fast path (default behavior at these shapes).
    out_fast = jax.block_until_ready(positional_encoding_forward(x, encoding))
    assert jnp.allclose(out_fast, ref, atol=1e-6, rtol=1e-6), "fast path mismatch vs reference"

    print("KERNEL_OK")
</pallas_src>

<mosaic_0001>
module attributes {stable_mosaic.version = 11 : i64} {
  func.func @_pe_add_kernel(%arg0: i32, %arg1: i32, %arg2: memref<2x256xf32, #tpu.memory_space<vmem>>, %arg3: memref<1x256xf32, #tpu.memory_space<vmem>>, %arg4: memref<2x256xf32, #tpu.memory_space<vmem>>) attributes {dimension_semantics = [#tpu.dimension_semantics<parallel>, #tpu.dimension_semantics<arbitrary>], iteration_bounds = array<i64: 1, 1>, scalar_prefetch = 0 : i64, scratch_operands = 0 : i64, tpu.core_type = #tpu.core_type<tc>, window_params = [{transform_indices = @transform_0, window_bounds = array<i64: 2, 256>}, {transform_indices = @transform_1, window_bounds = array<i64: 1, 256>}, {transform_indices = @transform_2, window_bounds = array<i64: 2, 256>}]} {
    %c0 = arith.constant 0 : index
    %c0_0 = arith.constant 0 : index
    %0 = vector.load %arg2[%c0, %c0_0] : memref<2x256xf32, #tpu.memory_space<vmem>>, vector<2x256xf32>
    %c0_1 = arith.constant 0 : index
    %c0_2 = arith.constant 0 : index
    %1 = vector.load %arg3[%c0_1, %c0_2] : memref<1x256xf32, #tpu.memory_space<vmem>>, vector<1x256xf32>
    %2 = vector.broadcast %1 : vector<1x256xf32> to vector<2x256xf32>
    %3 = arith.addf %0, %2 : vector<2x256xf32>
    %c0_3 = arith.constant 0 : index
    %c0_4 = arith.constant 0 : index
    %4 = vector.load %arg4[%c0_3, %c0_4] : memref<2x256xf32, #tpu.memory_space<vmem>>, vector<2x256xf32>
    tpu.vector_store %arg4[%c0_3, %c0_4], %3 {strides = array<i32>} : memref<2x256xf32, #tpu.memory_space<vmem>>, vector<2x256xf32>,
    return
  }
  func.func @transform_0(%arg0: i32, %arg1: i32) -> (i32, i32) {
    %c0_i32 = arith.constant 0 : i32
    return %arg1, %arg0 : i32, i32
  }
  func.func @transform_1(%arg0: i32, %arg1: i32) -> (i32, i32) {
    %c0_i32 = arith.constant 0 : i32
    %c0_i32_0 = arith.constant 0 : i32
    return %c0_i32, %arg0 : i32, i32
  }
  func.func @transform_2(%arg0: i32, %arg1: i32) -> (i32, i32) {
    %c0_i32 = arith.constant 0 : i32
    return %arg1, %arg0 : i32, i32
  }
}

</mosaic_0001>

<bundles_post_ra>
// kernel: tpu_custom_call.1
= control target key start
LH: loop header
LB: loop body
LE: loop exit
PB: predicated region body
PF: predicated region fallthrough
CT: control target
= control target key end

     0   :  { %7 = vsyncpa [#allocation3], 0  ;;  %s177_s0 = inlined_call_operand.hbm [shape: f32[2,256], index: 0, kind: input, shape index: {}]   ;;  %s178_s1 = inlined_call_operand.hbm [shape: f32[1,256], index: 1, kind: input, shape index: {}]   ;;  %s179_s2 = inlined_call_operand.hbm [shape: f32[2,256], index: 2, kind: output, shape index: {}]  }
   0x1   :  { %8 = vsyncpa [#allocation6], 0 }
   0x2   :  { %9 = vsyncpa [#allocation4], 0  ;;  %s15_s11 = sshll.u32 %s177_s0, 4  ;;  %s150_s12 = smov [#allocation2]   ;;  %s16_s11 = int_to_ptr.hbm [resolvable:$true] %s15_s11 }
   0x3   :  { %s17_s13 = sshll.u32 %s150_s12, 4  ;;  %s26_s16 = sshll.u32 %s178_s1, 4  ;;  %s18_s13 = int_to_ptr.vmem [resolvable:$true] %s17_s13  ;;  %s27_s16 = int_to_ptr.hbm [resolvable:$true] %s26_s16 }
   0x4   :  { %20 = dma.hbm_to_vmem [thread:$0]  %s16_s11, 64, %s18_s13, [#allocation3]  }
   0x5   :  { %s151_s17 = smov [#allocation5]  }
   0x6   :  { %s28_s18 = sshll.u32 %s151_s17, 4  ;;  %s29_s18 = int_to_ptr.vmem [resolvable:$true] %s28_s18 }
   0x7   :  { %31 = dma.hbm_to_vmem [thread:$0]  %s27_s16, 32, %s29_s18, [#allocation6]  }
   0x8   :  { %144 = dma.done.wait [#allocation3], 64  }
   0x9   :  { %145 = vsyncadd [#allocation3], 4294967232 }
   0xa   :  { %146 = dma.done.wait [#allocation6], 32  }
   0xb   :  { %147 = vsyncadd [#allocation6], 4294967264  ;;  %v41_v0 = vld [vmem:[#allocation5] sm:$0x3]  ;;  %vm46_vm0 = vcmask 1041408   ;;  %s152_s0 = smov [#allocation7]  }
   0xc   :  { %v43_v1 = vperm.slane %v41_v0, 0  ;;  %v44_v2 = vperm.slane %v41_v0, 1  ;;  %v40_v3 = vld [vmem:[#allocation2] sm:$0xf]  ;;  %s56_s19 = sshll.u32 %s152_s0, 4  ;;  %s58_s21 = sshll.u32 %s179_s2, 4  ;;  %s57_s19 = int_to_ptr.vmem [resolvable:$true] %s56_s19  ;;  %s59_s21 = int_to_ptr.hbm [resolvable:$true] %s58_s21 }
   0xe   :  { %v45_v4 = vrot.slane %v44_v2, 6 }
  0x10   :  { %v47_v5 = vsel %vm46_vm0, %v43_v1, %v45_v4 }
  0x11   :  { %v49_v6 = vadd.f32 %v47_v5, %v40_v3 }
  0x13   :  { %50 = vst [vmem:[#allocation7] sm:$0xf] %v49_v6 }
  0x14   :  { %61 = dma.vmem_to_hbm [thread:$0]  %s57_s19, 64, %s59_s21, [#allocation4]  }
  0x15   :  { %148 = dma.done.wait [#allocation4], 64  }
  0x16   :  { %149 = vsyncadd [#allocation4], 4294967232 }
  0x17   :  { %66 = vsyncpa [#allocation3], 1 }
  0x18   :  { %67 = vsyncpa [#allocation6], 1 }
  0x19   :  { %68 = vsyncpa [#allocation4], 1 }

</bundles_post_ra>
